<compile_context>
chip_gen: v5e
topology: v5e:2x2
jax: 0.10.0
libtpu: 0.0.40
codegen_flags: <defaults>
</compile_context>

<pallas_src>
import functools

import jax
import jax.numpy as jnp
from jax.experimental import pallas as pl
from jax.experimental.pallas import tpu as pltpu


def _linear_tanh_kernel(x_ref, w_ref, b_ref, o_ref):
    # x_ref: (tm, d_in), w_ref: (d_in, d_out) -> plain MXU matmul, f32 accumulate.
    y = jnp.dot(x_ref[...], w_ref[...], preferred_element_type=jnp.float32)
    y = y + b_ref[...]                              # (1, d_out) broadcast (VPU)
    o_ref[...] = jnp.tanh(y).astype(o_ref.dtype)    # tanh on the EUP


def prepare_params(weight, bias):
    """One-time parameter prep, hoisted out of the per-forward path.

    weight: (d_out, d_in) in PyTorch nn.Linear convention.
    Returns (w_t, b2) with w_t: (d_in, d_out), b2: (1, d_out).
    """
    w_t = jnp.asarray(weight).T
    b2 = jnp.asarray(bias).reshape(1, -1)
    return w_t, b2


def _round_up(x, m):
    return (x + m - 1) // m * m


@functools.partial(jax.jit, static_argnames=("block_m",))
def linear_tanh_forward(x, w_t, b, block_m=4096):
    """y = tanh(x @ w_t + b).

    x:   (B, d_in)    float32
    w_t: (d_in, d_out) float32 (pre-transposed once via prepare_params)
    b:   (1, d_out)   float32
    """
    B, d_in = x.shape
    d_out = w_t.shape[1]
    itemsize = 4  # float32

    cost = pl.CostEstimate(
        flops=2 * B * d_in * d_out,
        transcendentals=B * d_out,
        bytes_accessed=itemsize * (B * d_in + d_in * d_out + d_out + B * d_out),
    )

    full_bytes = itemsize * (B * d_in + d_in * d_out + d_out + B * d_out)

    # ------------------------------------------------------------------ small path
    # Whole problem resident in VMEM, no grid -> no pipeline prologue/epilogue.
    # Guarded by a footprint check so large d_in / B falls through to the tiled path.
    if B <= 1024 and full_bytes <= 12 * 1024 * 1024:
        return pl.pallas_call(
            _linear_tanh_kernel,
            out_shape=jax.ShapeDtypeStruct((B, d_out), x.dtype),
            in_specs=[
                pl.BlockSpec(memory_space=pltpu.MemorySpace.VMEM),
                pl.BlockSpec(memory_space=pltpu.MemorySpace.VMEM),
                pl.BlockSpec(memory_space=pltpu.MemorySpace.VMEM),
            ],
            out_specs=pl.BlockSpec(memory_space=pltpu.MemorySpace.VMEM),
            cost_estimate=cost,
        )(x, w_t, b)

    # ------------------------------------------------------------------ tiled path
    # At least 2 blocks (feeds both TensorCores on v7x), tile capped at block_m.
    tm = min(block_m, _round_up(pl.cdiv(B, 2), 8))

    def step_bytes(t):
        # double-buffered x and out tiles + grid-invariant weight/bias
        return (2 * itemsize * t * (d_in + d_out)
                + itemsize * (d_in * d_out + d_out))

    while tm > 8 and step_bytes(tm) > 24 * 1024 * 1024:
        tm //= 2
    tm = max(_round_up(tm, 8), 8)
    # TODO(synk): K-tile the contraction (grid over d_in + f32 accumulator) if the
    # untiled (d_in, d_out) weight itself ever exceeds the VMEM budget.

    grid = (pl.cdiv(B, tm),)  # ragged last block: OOB rows are masked on store

    need = step_bytes(tm)
    vmem_limit = None
    if need > 12 * 1024 * 1024:
        # Raise the scoped budget only when needed; leave headroom and never claim
        # the full 64 MiB physical VMEM of a v7x TensorCore.
        vmem_limit = min(int(need * 1.25) + (4 << 20), 44 * 1024 * 1024)

    return pl.pallas_call(
        _linear_tanh_kernel,
        out_shape=jax.ShapeDtypeStruct((B, d_out), x.dtype),
        grid=grid,
        in_specs=[
            pl.BlockSpec((tm, d_in), lambda i: (i, 0)),
            pl.BlockSpec((d_in, d_out), lambda i: (0, 0)),
            pl.BlockSpec((1, d_out), lambda i: (0, 0)),
        ],
        out_specs=pl.BlockSpec((tm, d_out), lambda i: (i, 0)),
        compiler_params=pltpu.CompilerParams(
            dimension_semantics=("parallel",),
            vmem_limit_bytes=vmem_limit,
        ),
        cost_estimate=cost,
    )(x, w_t, b)


def linear_regression_forward(x, weight, bias, block_m=4096):
    """Convenience wrapper taking params in PyTorch nn.Linear layout."""
    w_t, b2 = prepare_params(weight, bias)
    return linear_tanh_forward(x, w_t, b2, block_m=block_m)


if __name__ == "__main__":
    # Shapes implied by the module: x (B, input_dim) -> (B, output_dim)
    batch, input_dim, output_dim = 8, 32, 16

    key = jax.random.PRNGKey(0)
    kx, kw, kb, kx2 = jax.random.split(key, 4)

    # Deterministic init mimicking nn.Linear default: U(-1/sqrt(in), 1/sqrt(in))
    bound = 1.0 / jnp.sqrt(jnp.float32(input_dim))
    weight = jax.random.uniform(kw, (output_dim, input_dim), jnp.float32,
                                minval=-bound, maxval=bound)
    bias = jax.random.uniform(kb, (output_dim,), jnp.float32,
                              minval=-bound, maxval=bound)
    x = jax.random.normal(kx, (batch, input_dim), jnp.float32)

    # Params prepared once, reused for every forward call.
    w_t, b2 = prepare_params(weight, bias)

    # Small-batch (whole-array-in-VMEM) path.
    out = jax.block_until_ready(linear_tanh_forward(x, w_t, b2))
    ref = jnp.tanh(x @ weight.T + bias)
    assert out.shape == (batch, output_dim)
    assert jnp.allclose(out, ref, atol=1e-5, rtol=1e-5)

    # Tiled ("parallel" grid) path with a ragged last block (3000 % tile != 0).
    x_big = jax.random.normal(kx2, (3000, input_dim), jnp.float32)
    out_big = jax.block_until_ready(linear_tanh_forward(x_big, w_t, b2))
    ref_big = jnp.tanh(x_big @ weight.T + bias)
    assert out_big.shape == (3000, output_dim)
    assert jnp.allclose(out_big, ref_big, atol=1e-5, rtol=1e-5)

    print("KERNEL_OK")
</pallas_src>

<mosaic_0001>
module attributes {stable_mosaic.version = 11 : i64} {
  func.func @_linear_tanh_kernel(%arg0: memref<8x32xf32, #tpu.memory_space<vmem>>, %arg1: memref<32x16xf32, #tpu.memory_space<vmem>>, %arg2: memref<1x16xf32, #tpu.memory_space<vmem>>, %arg3: memref<8x16xf32, #tpu.memory_space<vmem>>) attributes {dimension_semantics = [], scalar_prefetch = 0 : i64, scratch_operands = 0 : i64, tpu.core_type = #tpu.core_type<tc>} {
    %c0 = arith.constant 0 : index
    %c0_0 = arith.constant 0 : index
    %0 = vector.load %arg0[%c0, %c0_0] : memref<8x32xf32, #tpu.memory_space<vmem>>, vector<8x32xf32>
    %c0_1 = arith.constant 0 : index
    %c0_2 = arith.constant 0 : index
    %1 = vector.load %arg1[%c0_1, %c0_2] : memref<32x16xf32, #tpu.memory_space<vmem>>, vector<32x16xf32>
    %cst = arith.constant dense<0.000000e+00> : vector<8x16xf32>
    %2 = tpu.matmul %0, %1, %cst {dimension_numbers = #tpu.dot_dimension_numbers<[1], [0], [0], [1], [0, 0, 1, 1], [], []>} : vector<8x32xf32>, vector<32x16xf32>, vector<8x16xf32> -> vector<8x16xf32>
    %c0_3 = arith.constant 0 : index
    %c0_4 = arith.constant 0 : index
    %3 = vector.load %arg2[%c0_3, %c0_4] : memref<1x16xf32, #tpu.memory_space<vmem>>, vector<1x16xf32>
    %4 = vector.broadcast %3 : vector<1x16xf32> to vector<8x16xf32>
    %5 = arith.addf %2, %4 : vector<8x16xf32>
    %6 = math.tanh %5 : vector<8x16xf32>
    %c0_5 = arith.constant 0 : index
    %c0_6 = arith.constant 0 : index
    %7 = vector.load %arg3[%c0_5, %c0_6] : memref<8x16xf32, #tpu.memory_space<vmem>>, vector<8x16xf32>
    tpu.vector_store %arg3[%c0_5, %c0_6], %6 {strides = array<i32>} : memref<8x16xf32, #tpu.memory_space<vmem>>, vector<8x16xf32>,
    return
  }
}

</mosaic_0001>

<bundles_post_ra>
// kernel: linear_tanh_forward.1
= control target key start
LH: loop header
LB: loop body
LE: loop exit
PB: predicated region body
PF: predicated region fallthrough
CT: control target
= control target key end

     0   :  { %s140_s0 = inlined_call_operand.vmem [shape: f32[8,32], index: 0, kind: input, shape index: {}]   ;;  %s141_s1 = inlined_call_operand.vmem [shape: f32[32,16], index: 1, kind: input, shape index: {}]   ;;  %s142_s2 = inlined_call_operand.vmem [shape: f32[1,16], index: 2, kind: input, shape index: {}]   ;;  %s143_s3 = inlined_call_operand.hbm [shape: f32[8,16], index: 3, kind: output, shape index: {}]  }
   0x1   :  { %v19_v0 = vld [vmem:[%s141_s1 + $0x18] sm:$0xff]  ;;  %v18_v1 = vld [vmem:[%s141_s1 + $0x10] sm:$0xff]  ;;  %v17_v2 = vld [vmem:[%s141_s1 + $0x8] sm:$0xff] }
   0x2   :  { %40 = vmatpush.msra.mxu0 %v19_v0 }
   0x3   :  { %8 = vsyncpa [#allocation3], 0  ;;  %v16_v3 = vld [vmem:[%s141_s1] sm:$0xff]  ;;  %vm24_vm0 = vcmask 261120   ;;  %s98_s24 = smov [#allocation2]   ;;  %s58_s1 = sshll.u32 %s143_s3, 4  ;;  %s59_s1 = int_to_ptr.hbm [resolvable:$true] %s58_s1 }
   0x4   :  { %41 = vmatpush.msra.mxu0 %v18_v1  ;;  %v15_v4 = vld [vmem:[%s140_s0] sm:$0xff]  ;;  %s56_s25 = sshll.u32 %s98_s24, 4  ;;  %vm49_vm1 = vcmask 130048   ;;  %s57_s25 = int_to_ptr.vmem [resolvable:$true] %s56_s25 }
   0x5   :  { %v69_v5 = vld [vmem:[%s142_s2] ss:$0 sm:$0xff] }
   0x6   :  { %42 = vmatpush.msra.mxu0 %v17_v2 }
   0x8   :  { %43 = vmatpush.msra.mxu0 %v16_v3 }
   0x9   :  { %67 = vmatmul.msk.f32.vlgmr.msra.gmra.mxu0 %vm24_vm0, %v15_v4 }
  0x86   :  { %v45_v6 = vpop.f32.mrf.mxu0 }
  0x87   :  { %v46_v7 = vadd.f32 %v69_v5, %v45_v6 }
  0x89   :  { %70 = vtanh.f32 %v46_v7 }
  0x8f   :  { %v71_v8 = vpop.eup %70 }
  0x90   :  { %50 = vst.msk [vmem:[#allocation2] sm:$0xff] %vm49_vm1, %v71_v8 }
  0x91   :  { %61 = dma.vmem_to_hbm [thread:$0]  %s57_s25, 128, %s59_s1, [#allocation3]  }
  0x92   :  { %96 = dma.done.wait [#allocation3], 128  }
  0x93   :  { %97 = vsyncadd [#allocation3], 4294967168 }
  0x94   :  { %66 = vsyncpa [#allocation3], 1 }

</bundles_post_ra>
